<compile_context>
chip_gen: v6e
topology: v6e:2x2x1
jax: 0.10.0
libtpu: 0.0.40
codegen_flags: <defaults>
</compile_context>

<pallas_src>
import functools

import jax
import jax.numpy as jnp
from jax.experimental import pallas as pl
from jax.experimental.pallas import tpu as pltpu

_LANE = 128
_EPS = 1e-5


def _round_up(v: int, m: int) -> int:
    return ((v + m - 1) // m) * m


def _pad2d(a, rows, cols, fill=0.0):
    r, c = a.shape
    if r == rows and c == cols:
        return a
    return jnp.pad(a, ((0, rows - r), (0, cols - c)), constant_values=fill)


# ---------------------------------------------------------------------------
# Kernels
# ---------------------------------------------------------------------------
def _make_kernel_plain(n_layers: int):
    """(Linear -> ReLU) * n_layers -> Linear. Batch-tiled; weights VMEM-resident."""

    def kernel(*refs):
        x_ref = refs[0]
        out_ref = refs[-1]
        p = refs[1:-1]

        h = x_ref[...]                                   # bf16 [TB, in_pad]
        idx = 0
        for _ in range(n_layers):
            w = p[idx][...]                              # bf16 [in_pad, n_pad]
            b = p[idx + 1][...]                          # f32  [1, n_pad]
            idx += 2
            h = jnp.dot(h.astype(jnp.bfloat16), w,
                        preferred_element_type=jnp.float32) + b
            h = jnp.maximum(h, 0.0)
        wf = p[idx][...]                                 # bf16 [n_pad, out_pad]
        bf = p[idx + 1][...]                             # f32  [1, out_pad]
        out = jnp.dot(h.astype(jnp.bfloat16), wf,
                      preferred_element_type=jnp.float32) + bf
        out_ref[...] = out.astype(out_ref.dtype)

    return kernel


def _make_kernel_bn(n_layers: int, batch: int):
    """(Linear -> BatchNorm1d(train) -> ReLU) * n_layers -> Linear, full batch resident.

    * Pre-BN Linear bias is dropped: BN subtracts the per-feature batch mean, which cancels
      the bias exactly (the bias is not even passed to the kernel).
    * BN folded to one scale/shift: scale = gamma * rsqrt(var + eps), shift = beta - mean*scale.
    * One-pass sum / sum-of-squares variance (slightly less stable than two-pass, fine for the
      O(1) f32 activations produced here); clamped at 0 for safety on zero-padded columns.
    """
    inv_b = 1.0 / float(batch)

    def kernel(*refs):
        x_ref = refs[0]
        out_ref = refs[-1]
        p = refs[1:-1]

        h = x_ref[...].astype(jnp.bfloat16)              # [B, in_pad]
        idx = 0
        for _ in range(n_layers):
            w = p[idx][...]                              # bf16 [in_pad, n_pad]
            gamma = p[idx + 1][...]                      # f32  [1, n_pad]
            beta = p[idx + 2][...]                       # f32  [1, n_pad]
            idx += 3
            h = jnp.dot(h, w, preferred_element_type=jnp.float32)   # f32 [B, n_pad]

            mean = jnp.sum(h, axis=0, keepdims=True) * inv_b
            ex2 = jnp.sum(h * h, axis=0, keepdims=True) * inv_b
            var = jnp.maximum(ex2 - mean * mean, 0.0)
            scale = gamma * jax.lax.rsqrt(var + _EPS)    # rsqrt -> EUP slot (free)
            shift = beta - mean * scale
            h = jnp.maximum(h * scale + shift, 0.0).astype(jnp.bfloat16)

        wf = p[idx][...]                                 # bf16 [n_pad, out_pad]
        bf = p[idx + 1][...]                             # f32  [1, out_pad]
        out = jnp.dot(h, wf, preferred_element_type=jnp.float32) + bf
        out_ref[...] = out.astype(out_ref.dtype)

    return kernel


# ---------------------------------------------------------------------------
# Wrapper
# ---------------------------------------------------------------------------
def _prep_kernel_args(params, n_layers: int, batch_norm: int):
    """Pad feature dims to 128-lane multiples; cast matmul weights to bf16."""
    args = []
    idx = 0
    for _ in range(n_layers):
        w, b = params[idx], params[idx + 1]
        idx += 2
        w_p = _pad2d(w, _round_up(w.shape[0], _LANE),
                     _round_up(w.shape[1], _LANE)).astype(jnp.bfloat16)
        args.append(w_p)
        if batch_norm:
            gamma, beta = params[idx], params[idx + 1]
            idx += 2
            n_pad = _round_up(gamma.shape[1], _LANE)
            args.append(_pad2d(gamma, 1, n_pad, fill=1.0))
            args.append(_pad2d(beta, 1, n_pad))
            # Linear bias `b` intentionally dropped: BN cancels it exactly.
        else:
            args.append(_pad2d(b, 1, _round_up(b.shape[1], _LANE)))
    wf, bf = params[idx], params[idx + 1]
    args.append(_pad2d(wf, _round_up(wf.shape[0], _LANE),
                       _round_up(wf.shape[1], _LANE)).astype(jnp.bfloat16))
    args.append(_pad2d(bf, 1, _round_up(bf.shape[1], _LANE)))
    return args


@functools.partial(jax.jit, static_argnames=("n_layers", "batch_norm", "block_rows"))
def mlp_forward(x, params, *, n_layers, batch_norm, block_rows=512):
    B, in_size = x.shape
    out_size = params[-1].shape[-1]
    n_neurons = params[0].shape[-1]
    in_pad = _round_up(in_size, _LANE)
    n_pad = _round_up(n_neurons, _LANE)
    out_pad = _round_up(out_size, _LANE)

    kargs = _prep_kernel_args(params, n_layers, batch_norm)
    param_bytes = sum(int(a.size) * a.dtype.itemsize for a in kargs)

    if batch_norm:
        # Full-batch residency: BN statistics are over the whole batch and layers chain.
        x_p = _pad2d(x, B, in_pad).astype(jnp.bfloat16)
        act_bytes = B * (in_pad * 2 + 2 * n_pad * 4 + out_pad * 4)
        vmem_limit = int(min(max(2 * param_bytes + 2 * act_bytes + (8 << 20), 32 << 20),
                             48 << 20))
        kernel = _make_kernel_bn(n_layers, B)
        vmem = pl.BlockSpec(memory_space=pltpu.MemorySpace.VMEM)
        out = pl.pallas_call(
            kernel,
            out_shape=jax.ShapeDtypeStruct((B, out_pad), jnp.float32),
            in_specs=[vmem] * (1 + len(kargs)),
            out_specs=vmem,
            compiler_params=pltpu.CompilerParams(vmem_limit_bytes=vmem_limit),
        )(x_p, *kargs)
    else:
        tb = min(block_rows, _round_up(B, 16))          # multiple of 16 (bf16 sublane packing)
        b_pad = _round_up(B, tb)
        x_p = _pad2d(x, b_pad, in_pad).astype(jnp.bfloat16)
        act_bytes = tb * (in_pad * 2 + 2 * n_pad * 4 + out_pad * 4)
        vmem_limit = int(min(max(2 * param_bytes + 2 * act_bytes + (8 << 20), 32 << 20),
                             48 << 20))
        kernel = _make_kernel_plain(n_layers)
        in_specs = [pl.BlockSpec((tb, in_pad), lambda i: (i, 0))]
        # Constant block index -> weights/biases stay VMEM-resident; only activations re-DMA.
        in_specs += [pl.BlockSpec(a.shape, lambda i: (0, 0)) for a in kargs]
        out = pl.pallas_call(
            kernel,
            out_shape=jax.ShapeDtypeStruct((b_pad, out_pad), jnp.float32),
            grid=(b_pad // tb,),
            in_specs=in_specs,
            out_specs=pl.BlockSpec((tb, out_pad), lambda i: (i, 0)),
            compiler_params=pltpu.CompilerParams(
                dimension_semantics=("parallel",),
                vmem_limit_bytes=vmem_limit,
            ),
        )(x_p, *kargs)

    return out[:B, :out_size]


# ---------------------------------------------------------------------------
# Params / reference
# ---------------------------------------------------------------------------
def init_mlp_params(key, in_size, out_size, n_neurons, n_layers, batch_norm):
    """Shapes mirror the PyTorch module; Linear weights stored transposed [in, out]."""
    params = []
    for i in range(n_layers):
        fan_in = in_size if i == 0 else n_neurons
        key, kw, kb = jax.random.split(key, 3)
        bound = 1.0 / jnp.sqrt(jnp.float32(fan_in))
        params.append(jax.random.uniform(kw, (fan_in, n_neurons), jnp.float32, -bound, bound))
        params.append(jax.random.uniform(kb, (1, n_neurons), jnp.float32, -bound, bound))
        if batch_norm:
            params.append(jnp.ones((1, n_neurons), jnp.float32))   # gamma
            params.append(jnp.zeros((1, n_neurons), jnp.float32))  # beta
    key, kw, kb = jax.random.split(key, 3)
    bound = 1.0 / jnp.sqrt(jnp.float32(n_neurons))
    params.append(jax.random.uniform(kw, (n_neurons, out_size), jnp.float32, -bound, bound))
    params.append(jax.random.uniform(kb, (1, out_size), jnp.float32, -bound, bound))
    return params


def mlp_reference(x, params, *, n_layers, batch_norm):
    """Pure-JAX reference with PyTorch forward semantics (training-mode BN), using the same
    bf16-operand / f32-accumulation matmul policy as the kernel."""
    def mm(a, b):
        return jnp.dot(a.astype(jnp.bfloat16), b.astype(jnp.bfloat16),
                       preferred_element_type=jnp.float32)

    h = x.astype(jnp.float32)
    idx = 0
    for _ in range(n_layers):
        w, b = params[idx], params[idx + 1]
        idx += 2
        h = mm(h, w) + b
        if batch_norm:
            gamma, beta = params[idx], params[idx + 1]
            idx += 2
            mean = jnp.mean(h, axis=0, keepdims=True)
            var = jnp.mean((h - mean) ** 2, axis=0, keepdims=True)
            h = (h - mean) * jax.lax.rsqrt(var + _EPS) * gamma + beta
        h = jnp.maximum(h, 0.0)
    return mm(h, params[idx]) + params[idx + 1]


if __name__ == "__main__":
    # Small shapes consistent with the module: batch=256, in=16, hidden=32, out=8, 2 layers.
    B, in_size, out_size, n_neurons, n_layers = 256, 16, 8, 32, 2

    key = jax.random.PRNGKey(0)
    kx, kp = jax.random.split(key)
    x = jax.random.normal(kx, (B, in_size), jnp.float32)

    for batch_norm in (1, 0):   # exercise both the BN (full-batch) and gridded (tiled) paths
        params = init_mlp_params(kp, in_size, out_size, n_neurons, n_layers, batch_norm)
        out = mlp_forward(x, params, n_layers=n_layers, batch_norm=batch_norm, block_rows=128)
        out = jax.block_until_ready(out)
        ref = mlp_reference(x, params, n_layers=n_layers, batch_norm=batch_norm)
        assert out.shape == (B, out_size)
        # Tolerance accounts for bf16 rounding-path differences (dropped pre-BN bias / folded BN
        # change fp rounding slightly before each bf16 cast); real bugs show up as O(0.1+) errors.
        assert jnp.allclose(out, ref, atol=2e-2, rtol=2e-2), f"mismatch (batch_norm={batch_norm})"

    print("KERNEL_OK")
</pallas_src>

<mosaic_0001>
module attributes {stable_mosaic.version = 11 : i64} {
  func.func @kernel(%arg0: memref<256x128xbf16, #tpu.memory_space<vmem>>, %arg1: memref<128x128xbf16, #tpu.memory_space<vmem>>, %arg2: memref<1x128xf32, #tpu.memory_space<vmem>>, %arg3: memref<1x128xf32, #tpu.memory_space<vmem>>, %arg4: memref<128x128xbf16, #tpu.memory_space<vmem>>, %arg5: memref<1x128xf32, #tpu.memory_space<vmem>>, %arg6: memref<1x128xf32, #tpu.memory_space<vmem>>, %arg7: memref<128x128xbf16, #tpu.memory_space<vmem>>, %arg8: memref<1x128xf32, #tpu.memory_space<vmem>>, %arg9: memref<256x128xf32, #tpu.memory_space<vmem>>) attributes {dimension_semantics = [], scalar_prefetch = 0 : i64, scratch_operands = 0 : i64, tpu.core_type = #tpu.core_type<tc>} {
    %c0 = arith.constant 0 : index
    %c0_0 = arith.constant 0 : index
    %0 = vector.load %arg0[%c0, %c0_0] : memref<256x128xbf16, #tpu.memory_space<vmem>>, vector<256x128xbf16>
    %c0_1 = arith.constant 0 : index
    %c0_2 = arith.constant 0 : index
    %1 = vector.load %arg1[%c0_1, %c0_2] : memref<128x128xbf16, #tpu.memory_space<vmem>>, vector<128x128xbf16>
    %c0_3 = arith.constant 0 : index
    %c0_4 = arith.constant 0 : index
    %2 = vector.load %arg2[%c0_3, %c0_4] : memref<1x128xf32, #tpu.memory_space<vmem>>, vector<1x128xf32>
    %c0_5 = arith.constant 0 : index
    %c0_6 = arith.constant 0 : index
    %3 = vector.load %arg3[%c0_5, %c0_6] : memref<1x128xf32, #tpu.memory_space<vmem>>, vector<1x128xf32>
    %cst = arith.constant dense<0.000000e+00> : vector<256x128xf32>
    %4 = tpu.matmul %0, %1, %cst {dimension_numbers = #tpu.dot_dimension_numbers<[1], [0], [0], [1], [0, 0, 1, 1], [], []>} : vector<256x128xbf16>, vector<128x128xbf16>, vector<256x128xf32> -> vector<256x128xf32>
    %cst_7 = arith.constant dense<0.000000e+00> : vector<128xf32>
    %5 = vector.multi_reduction <add>, %4, %cst_7 [0] : vector<256x128xf32> to vector<128xf32>
    %6 = vector.shape_cast %5 : vector<128xf32> to vector<1x128xf32>
    %cst_8 = arith.constant 3.906250e-03 : f32
    %7 = vector.broadcast %cst_8 : f32 to vector<1x128xf32>
    %8 = arith.mulf %6, %7 : vector<1x128xf32>
    %9 = arith.mulf %4, %4 : vector<256x128xf32>
    %cst_9 = arith.constant dense<0.000000e+00> : vector<128xf32>
    %10 = vector.multi_reduction <add>, %9, %cst_9 [0] : vector<256x128xf32> to vector<128xf32>
    %11 = vector.shape_cast %10 : vector<128xf32> to vector<1x128xf32>
    %cst_10 = arith.constant 3.906250e-03 : f32
    %12 = vector.broadcast %cst_10 : f32 to vector<1x128xf32>
    %13 = arith.mulf %11, %12 : vector<1x128xf32>
    %14 = arith.mulf %8, %8 : vector<1x128xf32>
    %15 = arith.subf %13, %14 : vector<1x128xf32>
    %cst_11 = arith.constant 0.000000e+00 : f32
    %16 = vector.broadcast %cst_11 : f32 to vector<1x128xf32>
    %17 = arith.maximumf %15, %16 : vector<1x128xf32>
    %cst_12 = arith.constant 9.99999974E-6 : f32
    %18 = vector.broadcast %cst_12 : f32 to vector<1x128xf32>
    %19 = arith.addf %17, %18 : vector<1x128xf32>
    %20 = math.rsqrt %19 : vector<1x128xf32>
    %21 = arith.mulf %2, %20 : vector<1x128xf32>
    %22 = arith.mulf %8, %21 : vector<1x128xf32>
    %23 = arith.subf %3, %22 : vector<1x128xf32>
    %24 = vector.broadcast %21 : vector<1x128xf32> to vector<256x128xf32>
    %25 = arith.mulf %4, %24 : vector<256x128xf32>
    %26 = vector.broadcast %23 : vector<1x128xf32> to vector<256x128xf32>
    %27 = arith.addf %25, %26 : vector<256x128xf32>
    %cst_13 = arith.constant 0.000000e+00 : f32
    %28 = vector.broadcast %cst_13 : f32 to vector<256x128xf32>
    %29 = arith.maximumf %27, %28 : vector<256x128xf32>
    %30 = arith.truncf %29 : vector<256x128xf32> to vector<256x128xbf16>
    %c0_14 = arith.constant 0 : index
    %c0_15 = arith.constant 0 : index
    %31 = vector.load %arg4[%c0_14, %c0_15] : memref<128x128xbf16, #tpu.memory_space<vmem>>, vector<128x128xbf16>
    %c0_16 = arith.constant 0 : index
    %c0_17 = arith.constant 0 : index
    %32 = vector.load %arg5[%c0_16, %c0_17] : memref<1x128xf32, #tpu.memory_space<vmem>>, vector<1x128xf32>
    %c0_18 = arith.constant 0 : index
    %c0_19 = arith.constant 0 : index
    %33 = vector.load %arg6[%c0_18, %c0_19] : memref<1x128xf32, #tpu.memory_space<vmem>>, vector<1x128xf32>
    %cst_20 = arith.constant dense<0.000000e+00> : vector<256x128xf32>
    %34 = tpu.matmul %30, %31, %cst_20 {dimension_numbers = #tpu.dot_dimension_numbers<[1], [0], [0], [1], [0, 0, 1, 1], [], []>} : vector<256x128xbf16>, vector<128x128xbf16>, vector<256x128xf32> -> vector<256x128xf32>
    %cst_21 = arith.constant dense<0.000000e+00> : vector<128xf32>
    %35 = vector.multi_reduction <add>, %34, %cst_21 [0] : vector<256x128xf32> to vector<128xf32>
    %36 = vector.shape_cast %35 : vector<128xf32> to vector<1x128xf32>
    %cst_22 = arith.constant 3.906250e-03 : f32
    %37 = vector.broadcast %cst_22 : f32 to vector<1x128xf32>
    %38 = arith.mulf %36, %37 : vector<1x128xf32>
    %39 = arith.mulf %34, %34 : vector<256x128xf32>
    %cst_23 = arith.constant dense<0.000000e+00> : vector<128xf32>
    %40 = vector.multi_reduction <add>, %39, %cst_23 [0] : vector<256x128xf32> to vector<128xf32>
    %41 = vector.shape_cast %40 : vector<128xf32> to vector<1x128xf32>
    %cst_24 = arith.constant 3.906250e-03 : f32
    %42 = vector.broadcast %cst_24 : f32 to vector<1x128xf32>
    %43 = arith.mulf %41, %42 : vector<1x128xf32>
    %44 = arith.mulf %38, %38 : vector<1x128xf32>
    %45 = arith.subf %43, %44 : vector<1x128xf32>
    %cst_25 = arith.constant 0.000000e+00 : f32
    %46 = vector.broadcast %cst_25 : f32 to vector<1x128xf32>
    %47 = arith.maximumf %45, %46 : vector<1x128xf32>
    %cst_26 = arith.constant 9.99999974E-6 : f32
    %48 = vector.broadcast %cst_26 : f32 to vector<1x128xf32>
    %49 = arith.addf %47, %48 : vector<1x128xf32>
    %50 = math.rsqrt %49 : vector<1x128xf32>
    %51 = arith.mulf %32, %50 : vector<1x128xf32>
    %52 = arith.mulf %38, %51 : vector<1x128xf32>
    %53 = arith.subf %33, %52 : vector<1x128xf32>
    %54 = vector.broadcast %51 : vector<1x128xf32> to vector<256x128xf32>
    %55 = arith.mulf %34, %54 : vector<256x128xf32>
    %56 = vector.broadcast %53 : vector<1x128xf32> to vector<256x128xf32>
    %57 = arith.addf %55, %56 : vector<256x128xf32>
    %cst_27 = arith.constant 0.000000e+00 : f32
    %58 = vector.broadcast %cst_27 : f32 to vector<256x128xf32>
    %59 = arith.maximumf %57, %58 : vector<256x128xf32>
    %60 = arith.truncf %59 : vector<256x128xf32> to vector<256x128xbf16>
    %c0_28 = arith.constant 0 : index
    %c0_29 = arith.constant 0 : index
    %61 = vector.load %arg7[%c0_28, %c0_29] : memref<128x128xbf16, #tpu.memory_space<vmem>>, vector<128x128xbf16>
    %c0_30 = arith.constant 0 : index
    %c0_31 = arith.constant 0 : index
    %62 = vector.load %arg8[%c0_30, %c0_31] : memref<1x128xf32, #tpu.memory_space<vmem>>, vector<1x128xf32>
    %cst_32 = arith.constant dense<0.000000e+00> : vector<256x128xf32>
    %63 = tpu.matmul %60, %61, %cst_32 {dimension_numbers = #tpu.dot_dimension_numbers<[1], [0], [0], [1], [0, 0, 1, 1], [], []>} : vector<256x128xbf16>, vector<128x128xbf16>, vector<256x128xf32> -> vector<256x128xf32>
    %64 = vector.broadcast %62 : vector<1x128xf32> to vector<256x128xf32>
    %65 = arith.addf %63, %64 : vector<256x128xf32>
    %c0_33 = arith.constant 0 : index
    %c0_34 = arith.constant 0 : index
    %66 = vector.load %arg9[%c0_33, %c0_34] : memref<256x128xf32, #tpu.memory_space<vmem>>, vector<256x128xf32>
    tpu.vector_store %arg9[%c0_33, %c0_34], %65 {strides = array<i32>} : memref<256x128xf32, #tpu.memory_space<vmem>>, vector<256x128xf32>,
    return
  }
}

</mosaic_0001>

<bundles_post_ra>
// kernel: mlp_forward.1
= control target key start
LH: loop header
LB: loop body
LE: loop exit
PB: predicated region body
PF: predicated region fallthrough
CT: control target
= control target key end

     0   :  { %s2521_s1 = inlined_call_operand.vmem [shape: bf16[128,128], index: 1, kind: input, shape index: {}]   ;;  %s2522_s0 = inlined_call_operand.vmem [shape: bf16[256,128], index: 0, kind: input, shape index: {}]   ;;  %s2523_s4 = inlined_call_operand.vmem [shape: bf16[128,128], index: 4, kind: input, shape index: {}]   ;;  %s2524_s2 = inlined_call_operand.vmem [shape: f32[1,128], index: 2, kind: input, shape index: {}]   ;;  %s2525_s3 = inlined_call_operand.vmem [shape: f32[1,128], index: 3, kind: input, shape index: {}]   ;;  %s2526_s7 = inlined_call_operand.vmem [shape: bf16[128,128], index: 7, kind: input, shape index: {}]   ;;  %s2527_s5 = inlined_call_operand.vmem [shape: f32[1,128], index: 5, kind: input, shape index: {}]   ;;  %s2528_s6 = inlined_call_operand.vmem [shape: f32[1,128], index: 6, kind: input, shape index: {}]   ;;  %s2529_s8 = inlined_call_operand.vmem [shape: f32[1,128], index: 8, kind: input, shape index: {}]   ;;  %s2530_s9 = inlined_call_operand.vmem [shape: f32[256,128], index: 9, kind: output, shape index: {}]  }
   0x1   :  { %v1636_v0 = vld [vmem:[%s2521_s1 + $0x38] sm:$0xff]   ;;  %v1637_v1 = vld [vmem:[%s2521_s1 + $0x30] sm:$0xff]   ;;  %v1638_v2 = vld [vmem:[%s2521_s1 + $0x28] sm:$0xff]  }
   0x2   :  { %1476 = vmatprep.subr.bf16.mxu0 %v1636_v0  ;;  %1620 = vmatprep.subr.bf16.mxu1 %v1636_v0  ;;  %v1639_v3 = vld [vmem:[%s2521_s1 + $0x20] sm:$0xff]   ;;  %v1640_v5 = vld [vmem:[%s2521_s1 + $0x18] sm:$0xff]   ;;  %v1641_v6 = vld [vmem:[%s2521_s1 + $0x10] sm:$0xff]  }
   0x3   :  { %1477 = vmatpush3.bf16.msra.mxu0 %v1636_v0  ;;  %1628 = vmatpush3.bf16.msra.mxu1 %v1636_v0  ;;  %v1644_v4 = vld [vmem:[%s2522_s0] sm:$0xff]   ;;  %v1642_v8 = vld [vmem:[%s2521_s1 + $0x8] sm:$0xff]   ;;  %v1646_v12 = vld [vmem:[%s2522_s0 + $0x10] sm:$0xff]  }
   0x4   :  { %1478 = vmatprep.subr.bf16.mxu0 %v1637_v1  ;;  %1621 = vmatprep.subr.bf16.mxu1 %v1637_v1  ;;  %v1652_v7 = vld [vmem:[%s2522_s0 + $0x40] sm:$0xff]   ;;  %v1645_v10 = vld [vmem:[%s2522_s0 + $0x8] sm:$0xff]   ;;  %v1654_v13 = vld [vmem:[%s2522_s0 + $0x50] sm:$0xff]  }
   0x5   :  { %1492 = vmatprep.mubr.bf16.mxu0 %v1644_v4  ;;  %1508 = vmatprep.mubr.bf16.mxu1 %v1652_v7  ;;  %v1643_v9 = vld [vmem:[%s2521_s1] sm:$0xff]   ;;  %v1653_v11 = vld [vmem:[%s2522_s0 + $0x48] sm:$0xff]   ;;  %v1647_v14 = vld [vmem:[%s2522_s0 + $0x18] sm:$0xff]  }
   0x6   :  { %v1655_v15 = vld [vmem:[%s2522_s0 + $0x58] sm:$0xff]   ;;  %v1648_v16 = vld [vmem:[%s2522_s0 + $0x20] sm:$0xff]   ;;  %v1649_v18 = vld [vmem:[%s2522_s0 + $0x28] sm:$0xff]  }
   0x7   :  { %1479 = vmatpush3.bf16.msra.mxu0 %v1637_v1  ;;  %1629 = vmatpush3.bf16.msra.mxu1 %v1637_v1  ;;  %v1656_v17 = vld [vmem:[%s2522_s0 + $0x60] sm:$0xff]   ;;  %v1657_v19 = vld [vmem:[%s2522_s0 + $0x68] sm:$0xff]   ;;  %v1650_v20 = vld [vmem:[%s2522_s0 + $0x30] sm:$0xff]  }
   0x8   :  { %1480 = vmatprep.subr.bf16.mxu0 %v1638_v2  ;;  %1622 = vmatprep.subr.bf16.mxu1 %v1638_v2  ;;  %v1658_v21 = vld [vmem:[%s2522_s0 + $0x70] sm:$0xff]   ;;  %v1651_v22 = vld [vmem:[%s2522_s0 + $0x38] sm:$0xff]   ;;  %v1662_v26 = vld [vmem:[%s2523_s4 + $0x28] sm:$0xff]  }
   0x9   :  { %v1659_v23 = vld [vmem:[%s2522_s0 + $0x78] sm:$0xff]   ;;  %v1661_v25 = vld [vmem:[%s2523_s4 + $0x30] sm:$0xff]   ;;  %v1663_v27 = vld [vmem:[%s2523_s4 + $0x20] sm:$0xff]  }
   0xa   :  { %v1660_v24 = vld [vmem:[%s2523_s4 + $0x38] sm:$0xff]   ;;  %v1665_v29 = vld [vmem:[%s2523_s4 + $0x10] sm:$0xff]   ;;  %v1666_v30 = vld [vmem:[%s2523_s4 + $0x8] sm:$0xff]  }
   0xb   :  { %1481 = vmatpush3.bf16.msra.mxu0 %v1638_v2  ;;  %1630 = vmatpush3.bf16.msra.mxu1 %v1638_v2  ;;  %v1664_v28 = vld [vmem:[%s2523_s4 + $0x18] sm:$0xff]   ;;  %v1667_v31 = vld [vmem:[%s2523_s4] sm:$0xff]  }
   0xc   :  { %1482 = vmatprep.subr.bf16.mxu0 %v1639_v3  ;;  %1623 = vmatprep.subr.bf16.mxu1 %v1639_v3 }
   0xf   :  { %1483 = vmatpush3.bf16.msra.mxu0 %v1639_v3  ;;  %1631 = vmatpush3.bf16.msra.mxu1 %v1639_v3 }
  0x10   :  { %1484 = vmatprep.subr.bf16.mxu0 %v1640_v5  ;;  %1624 = vmatprep.subr.bf16.mxu1 %v1640_v5 }
  0x13   :  { %1485 = vmatpush3.bf16.msra.mxu0 %v1640_v5  ;;  %1632 = vmatpush3.bf16.msra.mxu1 %v1640_v5 }
  0x14   :  { %1486 = vmatprep.subr.bf16.mxu0 %v1641_v6  ;;  %1625 = vmatprep.subr.bf16.mxu1 %v1641_v6 }
  0x17   :  { %1487 = vmatpush3.bf16.msra.mxu0 %v1641_v6  ;;  %1633 = vmatpush3.bf16.msra.mxu1 %v1641_v6 }
  0x18   :  { %1488 = vmatprep.subr.bf16.mxu0 %v1642_v8  ;;  %1626 = vmatprep.subr.bf16.mxu1 %v1642_v8 }
  0x1b   :  { %1489 = vmatpush3.bf16.msra.mxu0 %v1642_v8  ;;  %1634 = vmatpush3.bf16.msra.mxu1 %v1642_v8 }
  0x1c   :  { %1490 = vmatprep.subr.bf16.mxu0 %v1643_v9  ;;  %1627 = vmatprep.subr.bf16.mxu1 %v1643_v9 }
  0x1f   :  { %1491 = vmatpush3.bf16.msra.mxu0 %v1643_v9  ;;  %1635 = vmatpush3.bf16.msra.mxu1 %v1643_v9 }
  0x20   :  { %1524 = vmatprep.subr.bf16.mxu1 %v1660_v24 }
  0x22   :  { %1493 = vmatmul.mubr.bf16.vlgmr.msra.gmra.mxu0 %v1645_v10  ;;  %1509 = vmatmul.mubr.bf16.vlgmr.msra.gmra.mxu1 %v1653_v11 }
  0x23   :  { %1496 = vmatprep.mubr.bf16.mxu0 %v1646_v12  ;;  %1512 = vmatprep.mubr.bf16.mxu1 %v1654_v13 }
  0x24   :  { %1525 = vmatpush3.bf16.msra.mxu1 %v1660_v24 }
  0x25   :  { %1526 = vmatprep.subr.bf16.mxu1 %v1661_v25 }
  0x28   :  { %1527 = vmatpush3.bf16.msra.mxu1 %v1661_v25 }
  0x29   :  { %1528 = vmatprep.subr.bf16.mxu1 %v1662_v26 }
  0x2a   :  { %1497 = vmatmul.mubr.bf16.gmra.mxu0 %v1647_v14  ;;  %1513 = vmatmul.mubr.bf16.gmra.mxu1 %v1655_v15 }
  0x2b   :  { %1500 = vmatprep.mubr.bf16.mxu0 %v1648_v16  ;;  %1516 = vmatprep.mubr.bf16.mxu1 %v1656_v17 }
  0x2c   :  { %1529 = vmatpush3.bf16.msra.mxu1 %v1662_v26 }
  0x2d   :  { %1530 = vmatprep.subr.bf16.mxu1 %v1663_v27 }
  0x30   :  { %1531 = vmatpush3.bf16.msra.mxu1 %v1663_v27 }
  0x31   :  { %1532 = vmatprep.subr.bf16.mxu1 %v1664_v28 }
  0x32   :  { %1501 = vmatmul.mubr.bf16.gmra.mxu0 %v1649_v18  ;;  %1517 = vmatmul.mubr.bf16.gmra.mxu1 %v1657_v19 }
  0x33   :  { %1504 = vmatprep.mubr.bf16.mxu0 %v1650_v20  ;;  %1520 = vmatprep.mubr.bf16.mxu1 %v1658_v21 }
  0x34   :  { %1533 = vmatpush3.bf16.msra.mxu1 %v1664_v28 }
  0x35   :  { %1534 = vmatprep.subr.bf16.mxu1 %v1665_v29 }
  0x38   :  { %1535 = vmatpush3.bf16.msra.mxu1 %v1665_v29 }
  0x39   :  { %1536 = vmatprep.subr.bf16.mxu1 %v1666_v30 }
  0x3a   :  { %1505 = vmatmul.mubr.bf16.gmra.mxu0 %v1651_v22  ;;  %1521 = vmatmul.mubr.bf16.gmra.mxu1 %v1659_v23 }
  0x3c   :  { %1537 = vmatpush3.bf16.msra.mxu1 %v1666_v30 }
  0x3d   :  { %1538 = vmatprep.subr.bf16.mxu1 %v1667_v31 }
  0x40   :  { %1539 = vmatpush3.bf16.msra.mxu1 %v1667_v31 }
  0xe2   :  { %v1826_v32 = vpop.f32.mrf.mxu0  ;;  %v1828_v33 = vpop.f32.mrf.mxu1 }
  0xe3   :  { %v428_v43 = vmul.f32 %v1826_v32, %v1826_v32 }
  0xe4   :  { %v1830_v34 = vpop.f32.mrf.mxu0  ;;  %v1834_v36 = vpop.f32.mrf.mxu1 }
  0xe5   :  { %v426_v38 = vmul.f32 %v1830_v34, %v1830_v34 }
  0xe6   :  { %v1832_v35 = vpop.f32.mrf.mxu0  ;;  %v1846_v42 = vpop.f32.mrf.mxu1 }
  0xe7   :  { %v429_v47 = vmul.f32 %v1832_v35, %v1832_v35 }
  0xe8   :  { %v1836_v37 = vpop.f32.mrf.mxu0  ;;  %v1858_v51 = vpop.f32.mrf.mxu1 }
  0xe9   :  { %v388_v39 = vadd.f32 %v1836_v37, %v1830_v34  ;;  %v427_v40 = vmul.f32 %v1836_v37, %v1836_v37 }
  0xea   :  { %v1844_v41 = vpop.f32.mrf.mxu0  ;;  %v1870_v60 = vpop.f32.mrf.mxu1 }
  0xeb   :  { %v389_v44 = vadd.f32 %v1826_v32, %v388_v39  ;;  %v458_v45 = vadd.f32 %v427_v40, %v426_v38  ;;  %v432_v61 = vmul.f32 %v1844_v41, %v1844_v41 }
  0xec   :  { %v1851_v46 = vpop.f32.mrf.mxu0  ;;  %v1882_v5 = vpop.f32.mrf.mxu1 }
  0xed   :  { %v459_v48 = vadd.f32 %v458_v45, %v428_v43  ;;  %v390_v49 = vadd.f32 %v1832_v35, %v389_v44  ;;  %v430_v53 = vmul.f32 %v1851_v46, %v1851_v46 }
  0xee   :  { %v1856_v50 = vpop.f32.mrf.mxu0  ;;  %v1894_v14 = vpop.f32.mrf.mxu1 }
  0xef   :  { %v391_v52 = vadd.f32 %v390_v49, %v1851_v46  ;;  %v460_v54 = vadd.f32 %v459_v48, %v429_v47  ;;  %v433_v1 = vmul.f32 %v1856_v50, %v1856_v50  ;;  %v442_v48 = vmul.f32 %v1834_v36, %v1834_v36 }
  0xf0   :  { %v1863_v55 = vpop.f32.mrf.mxu0  ;;  %v1906_v23 = vpop.f32.mrf.mxu1 }
  0xf1   :  { %v461_v56 = vadd.f32 %v460_v54, %v430_v53  ;;  %v392_v57 = vadd.f32 %v391_v52, %v1863_v55  ;;  %v431_v58 = vmul.f32 %v1863_v55, %v1863_v55  ;;  %v443_v54 = vmul.f32 %v1858_v51, %v1858_v51 }
  0xf2   :  { %v1868_v59 = vpop.f32.mrf.mxu0  ;;  %v1916_v31 = vpop.f32.mrf.mxu1 }
  0xf3   :  { %v393_v62 = vadd.f32 %v1844_v41, %v392_v57  ;;  %v462_v63 = vadd.f32 %v461_v56, %v431_v58  ;;  %v436_v15 = vmul.f32 %v1868_v59, %v1868_v59  ;;  %v444_v58 = vmul.f32 %v1828_v33, %v1828_v33 }
  0xf4   :  { %v1875_v0 = vpop.f32.mrf.mxu0  ;;  %v1924_v47 = vpop.f32.mrf.mxu1 }
  0xf5   :  { %v463_v2 = vadd.f32 %v462_v63, %v432_v61  ;;  %v394_v3 = vadd.f32 %v1856_v50, %v393_v62  ;;  %v434_v7 = vmul.f32 %v1875_v0, %v1875_v0  ;;  %v445_v63 = vmul.f32 %v1846_v42, %v1846_v42 }
  0xf6   :  { %v1880_v4 = vpop.f32.mrf.mxu0  ;;  %v1932_v57 = vpop.f32.mrf.mxu1 }
  0xf7   :  { %v395_v6 = vadd.f32 %v394_v3, %v1875_v0  ;;  %v464_v8 = vadd.f32 %v463_v2, %v433_v1  ;;  %v437_v19 = vmul.f32 %v1880_v4, %v1880_v4 }
  0xf8   :  { %v1887_v9 = vpop.f32.mrf.mxu0  ;;  %v1940_v3 = vpop.f32.mrf.mxu1 }
  0xf9   :  { %v465_v10 = vadd.f32 %v464_v8, %v434_v7  ;;  %v396_v11 = vadd.f32 %v395_v6, %v1887_v9  ;;  %v435_v12 = vmul.f32 %v1887_v9, %v1887_v9  ;;  %v446_v7 = vmul.f32 %v1882_v5, %v1882_v5 }
  0xfa   :  { %v1892_v13 = vpop.f32.mrf.mxu0 }
  0xfb   :  { %v397_v16 = vadd.f32 %v1868_v59, %v396_v11  ;;  %v466_v17 = vadd.f32 %v465_v10, %v435_v12  ;;  %v440_v38 = vmul.f32 %v1892_v13, %v1892_v13  ;;  %v447_v12 = vmul.f32 %v1906_v23, %v1906_v23 }
  0xfc   :  { %v1899_v18 = vpop.f32.mrf.mxu0 }
  0xfd   :  { %v467_v20 = vadd.f32 %v466_v17, %v436_v15  ;;  %v398_v21 = vadd.f32 %v1880_v4, %v397_v16  ;;  %v438_v25 = vmul.f32 %v1899_v18, %v1899_v18  ;;  %v1948_v15 = vpop.f32.mrf.mxu1  ;;  %v448_v16 = vmul.f32 %v1870_v60, %v1870_v60 }
  0xfe   :  { %v1904_v22 = vpop.f32.mrf.mxu0 }
  0xff   :  { %v399_v24 = vadd.f32 %v398_v21, %v1899_v18  ;;  %v468_v26 = vadd.f32 %v467_v20, %v437_v19  ;;  %v441_v43 = vmul.f32 %v1904_v22, %v1904_v22  ;;  %v449_v20 = vmul.f32 %v1894_v14, %v1894_v14 }
 0x100   :  { %v1911_v27 = vpop.f32.mrf.mxu0 }
 0x101   :  { %v469_v28 = vadd.f32 %v468_v26, %v438_v25  ;;  %v400_v29 = vadd.f32 %v399_v24, %v1911_v27  ;;  %v439_v30 = vmul.f32 %v1911_v27, %v1911_v27  ;;  %v1956_v25 = vpop.f32.mrf.mxu1 }
 0x103   :  { %v401_v39 = vadd.f32 %v1892_v13, %v400_v29  ;;  %v470_v40 = vadd.f32 %v469_v28, %v439_v30  ;;  %v450_v28 = vmul.f32 %v1924_v47, %v1924_v47 }
 0x105   :  { %v471_v44 = vadd.f32 %v470_v40, %v440_v38  ;;  %v402_v45 = vadd.f32 %v1904_v22, %v401_v39  ;;  %v451_v39 = vmul.f32 %v1940_v3, %v1940_v3  ;;  %v1964_v40 = vpop.f32.mrf.mxu1 }
 0x107   :  { %v403_v49 = vadd.f32 %v402_v45, %v1834_v36  ;;  %v472_v52 = vadd.f32 %v471_v44, %v441_v43  ;;  %v452_v43 = vmul.f32 %v1916_v31, %v1916_v31 }
 0x109   :  { %v404_v53 = vadd.f32 %v403_v49, %v1858_v51  ;;  %v473_v56 = vadd.f32 %v472_v52, %v442_v48  ;;  %v453_v48 = vmul.f32 %v1932_v57, %v1932_v57 }
 0x10b   :  { %v405_v61 = vadd.f32 %v1828_v33, %v404_v53  ;;  %v474_v62 = vadd.f32 %v473_v56, %v443_v54  ;;  %v1972_v53 = vpop.f32.mrf.mxu1  ;;  %v454_v56 = vmul.f32 %v1956_v25, %v1956_v25 }
 0x10d   :  { %v475_v1 = vadd.f32 %v474_v62, %v444_v58  ;;  %v406_v2 = vadd.f32 %v1846_v42, %v405_v61 }
 0x10f   :  { %v407_v6 = vadd.f32 %v406_v2, %v1882_v5  ;;  %v476_v8 = vadd.f32 %v475_v1, %v445_v63  ;;  %v455_v63 = vmul.f32 %v1972_v53, %v1972_v53  ;;  %v456_v1 = vmul.f32 %v1948_v15, %v1948_v15 }
 0x111   :  { %v477_v10 = vadd.f32 %v476_v8, %v446_v7  ;;  %v408_v11 = vadd.f32 %v407_v6, %v1906_v23  ;;  %v457_v7 = vmul.f32 %v1964_v40, %v1964_v40 }
 0x113   :  { %v409_v17 = vadd.f32 %v1870_v60, %v408_v11  ;;  %v478_v19 = vadd.f32 %v477_v10, %v447_v12 }
 0x115   :  { %v479_v21 = vadd.f32 %v478_v19, %v448_v16  ;;  %v410_v24 = vadd.f32 %v1894_v14, %v409_v17 }
 0x117   :  { %v411_v26 = vadd.f32 %v410_v24, %v1924_v47  ;;  %v480_v29 = vadd.f32 %v479_v21, %v449_v20 }
 0x119   :  { %v481_v30 = vadd.f32 %v480_v29, %v450_v28  ;;  %v412_v38 = vadd.f32 %v411_v26, %v1940_v3 }
 0x11b   :  { %v413_v44 = vadd.f32 %v1916_v31, %v412_v38  ;;  %v482_v45 = vadd.f32 %v481_v30, %v451_v39 }
 0x11d   :  { %v483_v49 = vadd.f32 %v482_v45, %v452_v43  ;;  %v414_v52 = vadd.f32 %v1932_v57, %v413_v44 }
 0x11f   :  { %v415_v54 = vadd.f32 %v414_v52, %v1956_v25  ;;  %v484_v58 = vadd.f32 %v483_v49, %v453_v48  ;;  %v81_v52 = vld [vmem:[%s2524_s2] sm:$0x1] }
 0x121   :  { %v485_v61 = vadd.f32 %v484_v58, %v454_v56  ;;  %v416_v62 = vadd.f32 %v415_v54, %v1972_v53  ;;  %v505_v54 = vlaneseq }
 0x123   :  { %v417_v2 = vadd.f32 %v1948_v15, %v416_v62  ;;  %v486_v6 = vadd.f32 %v485_v61, %v455_v63  ;;  %v506_v61 = vshrl.u32 %v505_v54, 7  ;;  %v82_v63 = vld [vmem:[%s2525_s3] sm:$0x1] }
 0x125   :  { %v418_v8 = vadd.f32 %v1964_v40, %v417_v2  ;;  %v487_v10 = vadd.f32 %v486_v6, %v456_v1  ;;  %v1992_v1 = vsub.s32 0, %v506_v61 }
 0x127   :  { %v419_v11 = vrot.slane %v418_v8, 4  ;;  %v488_v12 = vadd.f32 %v487_v10, %v457_v7 }
 0x129   :  { %v420_v16 = vadd.f32 %v419_v11, %v418_v8  ;;  %v489_v17 = vrot.slane %v488_v12, 4 }
 0x12b   :  { %v421_v19 = vrot.slane %v420_v16, 2  ;;  %v490_v20 = vadd.f32 %v489_v17, %v488_v12 }
 0x12d   :  { %v422_v21 = vadd.f32 %v421_v19, %v420_v16  ;;  %v491_v24 = vrot.slane %v490_v20, 2 }
 0x12f   :  { %v423_v26 = vrot.slane %v422_v21, 1  ;;  %v492_v28 = vadd.f32 %v491_v24, %v490_v20 }
 0x131   :  { %v424_v29 = vadd.f32 %v423_v26, %v422_v21  ;;  %v493_v30 = vrot.slane %v492_v28, 1 }
 0x133   :  { %v425_v38 = vmul.f32 0.00390625, %v424_v29  ;;  %v494_v39 = vadd.f32 %v493_v30, %v492_v28 }
 0x135   :  { %v495_v43 = vmul.f32 0.00390625, %v494_v39  ;;  %v496_v44 = vmul.f32 %v425_v38, %v425_v38 }
 0x137   :  { %v497_v45 = vsub.f32 %v495_v43, %v496_v44 }
 0x139   :  { %v498_v48 = vmax.f32 %v497_v45, 0.0 }
 0x13b   :  { %v499_v49 = vadd.f32 1e-05, %v498_v48 }
 0x13d   :  { %1676 = vrsqrt.f32 %v499_v49 }
 0x14a   :  { %v1677_v56 = vpop.eup %1676 }
 0x14b   :  { %v501_v58 = vmul.f32 %v1677_v56, %v81_v52 }
 0x14d   :  { %v502_v62 = vmul.f32 %v501_v58, %v425_v38  ;;  %v1995_v6 = vrot.slane %v501_v58, %v1992_v1 }
 0x14f   :  { %v503_v2 = vsub.f32 %v82_v63, %v502_v62  ;;  %v512_v8 = vmul.f32 %v1826_v32, %v1995_v6  ;;  %v513_v10 = vmul.f32 %v1832_v35, %v1995_v6  ;;  %v510_v11 = vmul.f32 %v1995_v6, %v1830_v34 }
 0x150   :  { %v511_v12 = vmul.f32 %v1995_v6, %v1836_v37  ;;  %v514_v16 = vmul.f32 %v1995_v6, %v1851_v46  ;;  %v515_v17 = vmul.f32 %v1995_v6, %v1863_v55  ;;  %v516_v55 = vmul.f32 %v1844_v41, %v1995_v6 }
 0x151   :  { %v1998_v7 = vrot.slane %v503_v2, %v1992_v1  ;;  %v517_v30 = vmul.f32 %v1856_v50, %v1995_v6  ;;  %v518_v39 = vmul.f32 %v1995_v6, %v1875_v0  ;;  %v519_v43 = vmul.f32 %v1995_v6, %v1887_v9 }
 0x152   :  { %v520_v9 = vmul.f32 %v1868_v59, %v1995_v6  ;;  %v521_v58 = vmul.f32 %v1880_v4, %v1995_v6  ;;  %v522_v61 = vmul.f32 %v1995_v6, %v1899_v18  ;;  %v523_v62 = vmul.f32 %v1995_v6, %v1911_v27 }
 0x153   :  { %v550_v19 = vadd.f32 %v1998_v7, %v512_v8  ;;  %v551_v20 = vadd.f32 %v1998_v7, %v513_v10  ;;  %v548_v32 = vadd.f32 %v1998_v7, %v510_v11  ;;  %v549_v35 = vadd.f32 %v1998_v7, %v511_v12 }
 0x154   :  { %v552_v21 = vadd.f32 %v1998_v7, %v514_v16  ;;  %v553_v34 = vadd.f32 %v1998_v7, %v515_v17  ;;  %v554_v45 = vadd.f32 %v1998_v7, %v516_v55  ;;  %v555_v48 = vadd.f32 %v1998_v7, %v517_v30 }
 0x155   :  { %v582_v24 = vmax.f32 %v550_v19, 0.0  ;;  %v583_v37 = vmax.f32 %v551_v20, 0.0  ;;  %v580_v26 = vmax.f32 %v548_v32, 0.0  ;;  %v581_v28 = vmax.f32 %v549_v35, 0.0 }
 0x156   :  { %v584_v46 = vmax.f32 %v552_v21, 0.0  ;;  %v585_v29 = vmax.f32 %v553_v34, 0.0  ;;  %v556_v49 = vadd.f32 %v1998_v7, %v518_v39  ;;  %v557_v52 = vadd.f32 %v1998_v7, %v519_v43 }
 0x157   :  { %v613_v38 = vpack.c.bf16 %v583_v37, %v582_v24  ;;  %v612_v44 = vpack.c.bf16 %v581_v28, %v580_v26  ;;  %v586_v50 = vmax.f32 %v554_v45, 0.0  ;;  %v587_v54 = vmax.f32 %v555_v48, 0.0 }
 0x158   :  { %v614_v41 = vpack.c.bf16 %v585_v29, %v584_v46  ;;  %v588_v56 = vmax.f32 %v556_v49, 0.0  ;;  %v589_v0 = vmax.f32 %v557_v52, 0.0  ;;  %v558_v63 = vadd.f32 %v1998_v7, %v520_v9 }
 0x159   :  { %1540 = vmatprep.mubr.bf16.mxu1 %v612_v44  ;;  %v559_v2 = vadd.f32 %v1998_v7, %v521_v58  ;;  %v615_v8 = vpack.c.bf16 %v587_v54, %v586_v50  ;;  %v560_v10 = vadd.f32 %v1998_v7, %v522_v61  ;;  %v561_v11 = vadd.f32 %v1998_v7, %v523_v62 }
 0x15a   :  { %1541 = vmatmul.mubr.bf16.vlgmr.msra.gmra.mxu1 %v613_v38  ;;  %v616_v12 = vpack.c.bf16 %v589_v0, %v588_v56  ;;  %v590_v59 = vmax.f32 %v558_v63, 0.0  ;;  %v524_v18 = vmul.f32 %v1892_v13, %v1995_v6  ;;  %v525_v27 = vmul.f32 %v1904_v22, %v1995_v6 }
 0x15b   :  { %1544 = vmatprep.mubr.bf16.mxu1 %v614_v41  ;;  %v591_v4 = vmax.f32 %v559_v2, 0.0  ;;  %v592_v16 = vmax.f32 %v560_v10, 0.0  ;;  %v593_v17 = vmax.f32 %v561_v11, 0.0  ;;  %v526_v19 = vmul.f32 %v1995_v6, %v1834_v36 }
 0x15c   :  { %v527_v20 = vmul.f32 %v1995_v6, %v1858_v51  ;;  %v562_v32 = vadd.f32 %v1998_v7, %v524_v18  ;;  %v563_v35 = vadd.f32 %v1998_v7, %v525_v27  ;;  %v528_v36 = vmul.f32 %v1828_v33, %v1995_v6 }
 0x15d   :  { %v617_v21 = vpack.c.bf16 %v591_v4, %v590_v59  ;;  %v564_v34 = vadd.f32 %v1998_v7, %v526_v19  ;;  %v618_v37 = vpack.c.bf16 %v593_v17, %v592_v16  ;;  %v529_v51 = vmul.f32 %v1846_v42, %v1995_v6 }
 0x15e   :  { %v565_v24 = vadd.f32 %v1998_v7, %v527_v20  ;;  %v594_v13 = vmax.f32 %v562_v32, 0.0  ;;  %v595_v22 = vmax.f32 %v563_v35, 0.0  ;;  %v530_v46 = vmul.f32 %v1995_v6, %v1882_v5 }
 0x15f   :  { %v596_v26 = vmax.f32 %v564_v34, 0.0  ;;  %v531_v29 = vmul.f32 %v1995_v6, %v1906_v23  ;;  %v566_v55 = vadd.f32 %v1998_v7, %v528_v36  ;;  %v567_v30 = vadd.f32 %v1998_v7, %v529_v51  ;;  %v1673_v34 = vld [vmem:[%s2526_s7 + $0x10] sm:$0xff]  }
 0x160   :  { %v597_v28 = vmax.f32 %v565_v24, 0.0  ;;  %v619_v38 = vpack.c.bf16 %v595_v22, %v594_v13  ;;  %v568_v39 = vadd.f32 %v1998_v7, %v530_v46  ;;  %v532_v5 = vmul.f32 %v1870_v60, %v1995_v6  ;;  %v1674_v24 = vld [vmem:[%s2526_s7 + $0x8] sm:$0xff]  }
 0x161   :  { %v569_v43 = vadd.f32 %v1998_v7, %v531_v29  ;;  %v598_v33 = vmax.f32 %v566_v55, 0.0  ;;  %v599_v42 = vmax.f32 %v567_v30, 0.0  ;;  %v533_v23 = vmul.f32 %v1894_v14, %v1995_v6 }
 0x162   :  { %1545 = vmatmul.mubr.bf16.gmra.mxu1 %v615_v8  ;;  %v620_v44 = vpack.c.bf16 %v597_v28, %v596_v26  ;;  %v600_v45 = vmax.f32 %v568_v39, 0.0  ;;  %v534_v49 = vmul.f32 %v1995_v6, %v1924_v47  ;;  %v535_v52 = vmul.f32 %v1995_v6, %v1940_v3 }
 0x163   :  { %1548 = vmatprep.mubr.bf16.mxu1 %v616_v12  ;;  %v601_v48 = vmax.f32 %v569_v43, 0.0  ;;  %v570_v41 = vadd.f32 %v1998_v7, %v532_v5  ;;  %v571_v50 = vadd.f32 %v1998_v7, %v533_v23  ;;  %v621_v54 = vpack.c.bf16 %v599_v42, %v598_v33 }
 0x164   :  { %v572_v56 = vadd.f32 %v1998_v7, %v534_v49  ;;  %v573_v0 = vadd.f32 %v1998_v7, %v535_v52  ;;  %v536_v47 = vmul.f32 %v1916_v31, %v1995_v6  ;;  %v537_v3 = vmul.f32 %v1932_v57, %v1995_v6 }
 0x165   :  { %v622_v9 = vpack.c.bf16 %v601_v48, %v600_v45  ;;  %v602_v60 = vmax.f32 %v570_v41, 0.0  ;;  %v603_v14 = vmax.f32 %v571_v50, 0.0  ;;  %v539_v62 = vmul.f32 %v1995_v6, %v1972_v53 }
 0x166   :  { %v604_v58 = vmax.f32 %v572_v56, 0.0  ;;  %v605_v61 = vmax.f32 %v573_v0, 0.0  ;;  %v538_v63 = vmul.f32 %v1995_v6, %v1956_v25  ;;  %v574_v2 = vadd.f32 %v1998_v7, %v536_v47 }
 0x167   :  { %v575_v8 = vadd.f32 %v1998_v7, %v537_v3  ;;  %v623_v10 = vpack.c.bf16 %v603_v14, %v602_v60  ;;  %v577_v11 = vadd.f32 %v1998_v7, %v539_v62  ;;  %v540_v53 = vmul.f32 %v1948_v15, %v1995_v6  ;;  %v1669_v15 = vld [vmem:[%s2526_s7 + $0x30] sm:$0xff]  }
 0x168   :  { %v576_v12 = vadd.f32 %v1998_v7, %v538_v63  ;;  %v624_v59 = vpack.c.bf16 %v605_v61, %v604_v58  ;;  %v606_v31 = vmax.f32 %v574_v2, 0.0  ;;  %v541_v25 = vmul.f32 %v1964_v40, %v1995_v6  ;;  %v1670_v40 = vld [vmem:[%s2526_s7 + $0x28] sm:$0xff]   ;;  %v1671_v6 = vld [vmem:[%s2526_s7 + $0x20] sm:$0xff]  }
 0x169   :  { %v607_v57 = vmax.f32 %v575_v8, 0.0  ;;  %v609_v16 = vmax.f32 %v577_v11, 0.0  ;;  %v578_v17 = vadd.f32 %v1998_v7, %v540_v53 }
 0x16a   :  { %1549 = vmatmul.mubr.bf16.gmra.mxu1 %v617_v21  ;;  %v608_v4 = vmax.f32 %v576_v12, 0.0  ;;  %v579_v18 = vadd.f32 %v1998_v7, %v541_v25  ;;  %v1668_v21 = vld [vmem:[%s2526_s7 + $0x38] sm:$0xff]  }
 0x16b   :  { %1552 = vmatprep.mubr.bf16.mxu1 %v618_v37  ;;  %v625_v27 = vpack.c.bf16 %v607_v57, %v606_v31  ;;  %v610_v20 = vmax.f32 %v578_v17, 0.0  ;;  %1572 = vmatprep.subr.bf16.mxu0 %v1668_v21  ;;  %v1672_v7 = vld [vmem:[%s2526_s7 + $0x18] sm:$0xff]   ;;  %v1675_v37 = vld [vmem:[%s2526_s7] sm:$0xff]  }
 0x16c   :  { %v626_v19 = vpack.c.bf16 %v609_v16, %v608_v4  ;;  %v611_v32 = vmax.f32 %v579_v18, 0.0  ;;  %1573 = vmatpush3.bf16.msra.mxu0 %v1668_v21 }
 0x16d   :  { %1574 = vmatprep.subr.bf16.mxu0 %v1669_v15 }
 0x16e   :  { %v627_v35 = vpack.c.bf16 %v611_v32, %v610_v20 }
 0x170   :  { %1575 = vmatpush3.bf16.msra.mxu0 %v1669_v15 }
 0x171   :  { %1576 = vmatprep.subr.bf16.mxu0 %v1670_v40 }
 0x172   :  { %1553 = vmatmul.mubr.bf16.gmra.mxu1 %v619_v38 }
 0x173   :  { %1556 = vmatprep.mubr.bf16.mxu1 %v620_v44 }
 0x174   :  { %1577 = vmatpush3.bf16.msra.mxu0 %v1670_v40 }
 0x175   :  { %1578 = vmatprep.subr.bf16.mxu0 %v1671_v6 }
 0x178   :  { %1579 = vmatpush3.bf16.msra.mxu0 %v1671_v6 }
 0x179   :  { %1580 = vmatprep.subr.bf16.mxu0 %v1672_v7 }
 0x17a   :  { %1557 = vmatmul.mubr.bf16.gmra.mxu1 %v621_v54 }
 0x17b   :  { %1560 = vmatprep.mubr.bf16.mxu1 %v622_v9 }
 0x17c   :  { %1581 = vmatpush3.bf16.msra.mxu0 %v1672_v7 }
 0x17d   :  { %1582 = vmatprep.subr.bf16.mxu0 %v1673_v34 }
 0x180   :  { %1583 = vmatpush3.bf16.msra.mxu0 %v1673_v34 }
 0x181   :  { %1584 = vmatprep.subr.bf16.mxu0 %v1674_v24 }
 0x182   :  { %1561 = vmatmul.mubr.bf16.gmra.mxu1 %v623_v10 }
 0x183   :  { %1564 = vmatprep.mubr.bf16.mxu1 %v624_v59 }
 0x184   :  { %1585 = vmatpush3.bf16.msra.mxu0 %v1674_v24 }
 0x185   :  { %1586 = vmatprep.subr.bf16.mxu0 %v1675_v37 }
 0x188   :  { %1587 = vmatpush3.bf16.msra.mxu0 %v1675_v37 }
 0x18a   :  { %1565 = vmatmul.mubr.bf16.gmra.mxu1 %v625_v27 }
 0x18b   :  { %1568 = vmatprep.mubr.bf16.mxu1 %v626_v19 }
 0x192   :  { %1569 = vmatmul.mubr.bf16.gmra.mxu1 %v627_v35 }
 0x21a   :  { %v2120_v13 = vpop.f32.mrf.mxu1 }
 0x21b   :  { %v895_v55 = vmul.f32 %v2120_v13, %v2120_v13 }
 0x21c   :  { %v2122_v22 = vpop.f32.mrf.mxu1 }
 0x21d   :  { %v893_v36 = vmul.f32 %v2122_v22, %v2122_v22 }
 0x21e   :  { %v2124_v26 = vpop.f32.mrf.mxu1 }
 0x21f   :  { %v896_v43 = vmul.f32 %v2124_v26, %v2124_v26 }
 0x220   :  { %v2126_v28 = vpop.f32.mrf.mxu1 }
 0x221   :  { %v855_v51 = vadd.f32 %v2126_v28, %v2122_v22  ;;  %v894_v46 = vmul.f32 %v2126_v28, %v2126_v28 }
 0x222   :  { %v2134_v29 = vpop.f32.mrf.mxu1 }
 0x223   :  { %v856_v30 = vadd.f32 %v2120_v13, %v855_v51  ;;  %v925_v38 = vadd.f32 %v894_v46, %v893_v36  ;;  %v899_v54 = vmul.f32 %v2134_v29, %v2134_v29 }
 0x224   :  { %v2139_v39 = vpop.f32.mrf.mxu1 }
 0x225   :  { %v926_v44 = vadd.f32 %v925_v38, %v895_v55  ;;  %v857_v33 = vadd.f32 %v2124_v26, %v856_v30  ;;  %v897_v48 = vmul.f32 %v2139_v39, %v2139_v39 }
 0x226   :  { %v2144_v42 = vpop.f32.mrf.mxu1 }
 0x227   :  { %v858_v45 = vadd.f32 %v857_v33, %v2139_v39  ;;  %v927_v5 = vadd.f32 %v926_v44, %v896_v43  ;;  %v900_v60 = vmul.f32 %v2144_v42, %v2144_v42 }
 0x228   :  { %v2149_v23 = vpop.f32.mrf.mxu1 }
 0x229   :  { %v928_v49 = vadd.f32 %v927_v5, %v897_v48  ;;  %v859_v52 = vadd.f32 %v858_v45, %v2149_v23  ;;  %v898_v41 = vmul.f32 %v2149_v23, %v2149_v23 }
 0x22a   :  { %v2154_v50 = vpop.f32.mrf.mxu1 }
 0x22b   :  { %v860_v56 = vadd.f32 %v2134_v29, %v859_v52  ;;  %v929_v0 = vadd.f32 %v928_v49, %v898_v41  ;;  %v903_v12 = vmul.f32 %v2154_v50, %v2154_v50 }
 0x22c   :  { %v2159_v9 = vpop.f32.mrf.mxu1 }
 0x22d   :  { %v930_v14 = vadd.f32 %v929_v0, %v899_v54  ;;  %v861_v58 = vadd.f32 %v2144_v42, %v860_v56  ;;  %v901_v3 = vmul.f32 %v2159_v9, %v2159_v9 }
 0x22e   :  { %v2164_v61 = vpop.f32.mrf.mxu1 }
 0x22f   :  { %v862_v47 = vadd.f32 %v861_v58, %v2159_v9  ;;  %v931_v62 = vadd.f32 %v930_v14, %v900_v60  ;;  %v904_v4 = vmul.f32 %v2164_v61, %v2164_v61 }
 0x230   :  { %v2169_v63 = vpop.f32.mrf.mxu1 }
 0x231   :  { %v932_v2 = vadd.f32 %v931_v62, %v901_v3  ;;  %v863_v8 = vadd.f32 %v862_v47, %v2169_v63  ;;  %v902_v10 = vmul.f32 %v2169_v63, %v2169_v63 }
 0x232   :  { %v2174_v11 = vpop.f32.mrf.mxu1 }
 0x233   :  { %v864_v59 = vadd.f32 %v2154_v50, %v863_v8  ;;  %v933_v31 = vadd.f32 %v932_v2, %v902_v10  ;;  %v907_v15 = vmul.f32 %v2174_v11, %v2174_v11 }
 0x234   :  { %v2179_v57 = vpop.f32.mrf.mxu1 }
 0x235   :  { %v934_v16 = vadd.f32 %v933_v31, %v903_v12  ;;  %v865_v53 = vadd.f32 %v2164_v61, %v864_v59  ;;  %v905_v18 = vmul.f32 %v2179_v57, %v2179_v57 }
 0x236   :  { %v2184_v25 = vpop.f32.mrf.mxu1 }
 0x237   :  { %v866_v17 = vadd.f32 %v865_v53, %v2179_v57  ;;  %v935_v27 = vadd.f32 %v934_v16, %v904_v4  ;;  %v908_v34 = vmul.f32 %v2184_v25, %v2184_v25 }
 0x238   :  { %v2189_v19 = vpop.f32.mrf.mxu1 }
 0x239   :  { %v936_v20 = vadd.f32 %v935_v27, %v905_v18  ;;  %v867_v32 = vadd.f32 %v866_v17, %v2189_v19  ;;  %v906_v35 = vmul.f32 %v2189_v19, %v2189_v19 }
 0x23a   :  { %v2194_v21 = vpop.f32.mrf.mxu1 }
 0x23b   :  { %v868_v40 = vadd.f32 %v2174_v11, %v867_v32  ;;  %v937_v6 = vadd.f32 %v936_v20, %v906_v35  ;;  %v911_v45 = vmul.f32 %v2194_v21, %v2194_v21 }
 0x23c   :  { %v2199_v7 = vpop.f32.mrf.mxu1 }
 0x23d   :  { %v938_v24 = vadd.f32 %v937_v6, %v907_v15  ;;  %v869_v37 = vadd.f32 %v2184_v25, %v868_v40  ;;  %v909_v46 = vmul.f32 %v2199_v7, %v2199_v7 }
 0x23e   :  { %v2204_v36 = vpop.f32.mrf.mxu1 }
 0x23f   :  { %v870_v51 = vadd.f32 %v869_v37, %v2199_v7  ;;  %v939_v55 = vadd.f32 %v938_v24, %v908_v34  ;;  %v912_v52 = vmul.f32 %v2204_v36, %v2204_v36 }
 0x240   :  { %v2209_v30 = vpop.f32.mrf.mxu1 }
 0x241   :  { %v940_v38 = vadd.f32 %v939_v55, %v909_v46  ;;  %v871_v43 = vadd.f32 %v870_v51, %v2209_v30  ;;  %v910_v44 = vmul.f32 %v2209_v30, %v2209_v30 }
 0x242   :  { %v2214_v33 = vpop.f32.mrf.mxu1 }
 0x243   :  { %v872_v48 = vadd.f32 %v2194_v21, %v871_v43  ;;  %v941_v5 = vadd.f32 %v940_v38, %v910_v44  ;;  %v915_v8 = vmul.f32 %v2214_v33, %v2214_v33 }
 0x244   :  { %v2219_v49 = vpop.f32.mrf.mxu1 }
 0x245   :  { %v942_v41 = vadd.f32 %v941_v5, %v911_v45  ;;  %v873_v54 = vadd.f32 %v2204_v36, %v872_v48  ;;  %v913_v60 = vmul.f32 %v2219_v49, %v2219_v49 }
 0x246   :  { %v2224_v56 = vpop.f32.mrf.mxu1 }
 0x247   :  { %v874_v0 = vadd.f32 %v873_v54, %v2219_v49  ;;  %v943_v14 = vadd.f32 %v942_v41, %v912_v52  ;;  %v916_v31 = vmul.f32 %v2224_v56, %v2224_v56 }
 0x248   :  { %v2229_v58 = vpop.f32.mrf.mxu1 }
 0x249   :  { %v944_v47 = vadd.f32 %v943_v14, %v913_v60  ;;  %v875_v3 = vadd.f32 %v874_v0, %v2229_v58  ;;  %v914_v62 = vmul.f32 %v2229_v58, %v2229_v58 }
 0x24a   :  { %v2234_v2 = vpop.f32.mrf.mxu1 }
 0x24b   :  { %v876_v10 = vadd.f32 %v2214_v33, %v875_v3  ;;  %v945_v12 = vadd.f32 %v944_v47, %v914_v62  ;;  %v919_v6 = vmul.f32 %v2234_v2, %v2234_v2 }
 0x24c   :  { %v2239_v59 = vpop.f32.mrf.mxu1 }
 0x24d   :  { %v946_v4 = vadd.f32 %v945_v12, %v915_v8  ;;  %v877_v16 = vadd.f32 %v2224_v56, %v876_v10  ;;  %v917_v18 = vmul.f32 %v2239_v59, %v2239_v59 }
 0x24e   :  { %v2244_v53 = vpop.f32.mrf.mxu1 }
 0x24f   :  { %v878_v17 = vadd.f32 %v877_v16, %v2239_v59  ;;  %v947_v27 = vadd.f32 %v946_v4, %v916_v31  ;;  %v920_v51 = vmul.f32 %v2244_v53, %v2244_v53 }
 0x250   :  { %v2249_v20 = vpop.f32.mrf.mxu1 }
 0x251   :  { %v948_v32 = vadd.f32 %v947_v27, %v917_v18  ;;  %v879_v35 = vadd.f32 %v878_v17, %v2249_v20  ;;  %v918_v15 = vmul.f32 %v2249_v20, %v2249_v20 }
 0x252   :  { %v2254_v40 = vpop.f32.mrf.mxu1 }
 0x253   :  { %v880_v34 = vadd.f32 %v2234_v2, %v879_v35  ;;  %v949_v24 = vadd.f32 %v948_v32, %v918_v15  ;;  %v923_v54 = vmul.f32 %v2254_v40, %v2254_v40 }
 0x254   :  { %v2259_v37 = vpop.f32.mrf.mxu1 }
 0x255   :  { %v950_v46 = vadd.f32 %v949_v24, %v919_v6  ;;  %v881_v55 = vadd.f32 %v2244_v53, %v880_v34  ;;  %v921_v44 = vmul.f32 %v2259_v37, %v2259_v37 }
 0x256   :  { %v2264_v38 = vpop.f32.mrf.mxu1 }
 0x257   :  { %v882_v43 = vadd.f32 %v881_v55, %v2259_v37  ;;  %v951_v45 = vadd.f32 %v950_v46, %v920_v51  ;;  %v924_v14 = vmul.f32 %v2264_v38, %v2264_v38 }
 0x258   :  { %v843_v48 = vpop.f32.mrf.mxu1 }
 0x259   :  { %v952_v5 = vadd.f32 %v951_v45, %v921_v44  ;;  %v883_v52 = vadd.f32 %v882_v43, %v843_v48  ;;  %v922_v41 = vmul.f32 %v843_v48, %v843_v48  ;;  %v644_v43 = vld [vmem:[%s2527_s5] sm:$0x1] }
 0x25b   :  { %v884_v0 = vadd.f32 %v2254_v40, %v883_v52  ;;  %v953_v60 = vadd.f32 %v952_v5, %v922_v41  ;;  %v645_v52 = vld [vmem:[%s2528_s6] sm:$0x1] }
 0x25d   :  { %v885_v47 = vadd.f32 %v2264_v38, %v884_v0  ;;  %v954_v3 = vadd.f32 %v953_v60, %v923_v54 }
 0x25f   :  { %v886_v62 = vrot.slane %v885_v47, 4  ;;  %v955_v8 = vadd.f32 %v954_v3, %v924_v14 }
 0x261   :  { %v887_v10 = vadd.f32 %v886_v62, %v885_v47  ;;  %v956_v12 = vrot.slane %v955_v8, 4 }
 0x263   :  { %v888_v31 = vrot.slane %v887_v10, 2  ;;  %v957_v4 = vadd.f32 %v956_v12, %v955_v8 }
 0x265   :  { %v889_v16 = vadd.f32 %v888_v31, %v887_v10  ;;  %v958_v17 = vrot.slane %v957_v4, 2 }
 0x267   :  { %v890_v18 = vrot.slane %v889_v16, 1  ;;  %v959_v27 = vadd.f32 %v958_v17, %v957_v4 }
 0x269   :  { %v891_v32 = vadd.f32 %v890_v18, %v889_v16  ;;  %v960_v35 = vrot.slane %v959_v27, 1 }
 0x26b   :  { %v892_v15 = vmul.f32 0.00390625, %v891_v32  ;;  %v961_v6 = vadd.f32 %v960_v35, %v959_v27 }
 0x26d   :  { %v962_v34 = vmul.f32 0.00390625, %v961_v6  ;;  %v963_v24 = vmul.f32 %v892_v15, %v892_v15 }
 0x26f   :  { %v964_v51 = vsub.f32 %v962_v34, %v963_v24 }
 0x271   :  { %v965_v46 = vmax.f32 %v964_v51, 0.0 }
 0x273   :  { %v966_v55 = vadd.f32 1e-05, %v965_v46 }
 0x275   :  { %1678 = vrsqrt.f32 %v966_v55 }
 0x282   :  { %v1679_v44 = vpop.eup %1678 }
 0x283   :  { %v968_v45 = vmul.f32 %v1679_v44, %v644_v43 }
 0x285   :  { %v969_v5 = vmul.f32 %v968_v45, %v892_v15  ;;  %v2282_v54 = vrot.slane %v968_v45, %v1992_v1 }
 0x287   :  { %v970_v41 = vsub.f32 %v645_v52, %v969_v5  ;;  %v979_v60 = vmul.f32 %v2120_v13, %v2282_v54  ;;  %v977_v14 = vmul.f32 %v2282_v54, %v2122_v22  ;;  %v978_v47 = vmul.f32 %v2282_v54, %v2126_v28 }
 0x288   :  { %v980_v3 = vmul.f32 %v2124_v26, %v2282_v54  ;;  %v981_v62 = vmul.f32 %v2282_v54, %v2139_v39  ;;  %v982_v8 = vmul.f32 %v2282_v54, %v2149_v23  ;;  %v1006_v26 = vmul.f32 %v2282_v54, %v843_v48 }
 0x289   :  { %v2285_v0 = vrot.slane %v970_v41, %v1992_v1  ;;  %v983_v23 = vmul.f32 %v2134_v29, %v2282_v54  ;;  %v984_v18 = vmul.f32 %v2144_v42, %v2282_v54  ;;  %v985_v27 = vmul.f32 %v2282_v54, %v2159_v9 }
 0x28a   :  { %v986_v48 = vmul.f32 %v2282_v54, %v2169_v63  ;;  %v1005_v34 = vmul.f32 %v2282_v54, %v2259_v37  ;;  %v1007_v29 = vmul.f32 %v2254_v40, %v2282_v54  ;;  %v1008_v9 = vmul.f32 %v2264_v38, %v2282_v54 }
 0x28b   :  { %v1017_v1 = vadd.f32 %v2285_v0, %v979_v60  ;;  %v1015_v10 = vadd.f32 %v2285_v0, %v977_v14  ;;  %v1016_v13 = vadd.f32 %v2285_v0, %v978_v47  ;;  %v1018_v22 = vadd.f32 %v2285_v0, %v980_v3 }
 0x28c   :  { %v1019_v12 = vadd.f32 %v2285_v0, %v981_v62  ;;  %v1020_v28 = vadd.f32 %v2285_v0, %v982_v8  ;;  %v1044_v35 = vadd.f32 %v2285_v0, %v1006_v26  ;;  %v1021_v24 = vadd.f32 %v2285_v0, %v983_v23 }
 0x28d   :  { %v1049_v31 = vmax.f32 %v1017_v1, 0.0  ;;  %v1050_v4 = vmax.f32 %v1018_v22, 0.0  ;;  %v1047_v39 = vmax.f32 %v1015_v10, 0.0  ;;  %v1048_v16 = vmax.f32 %v1016_v13, 0.0 }
 0x28e   :  { %v1051_v17 = vmax.f32 %v1019_v12, 0.0  ;;  %v1052_v32 = vmax.f32 %v1020_v28, 0.0  ;;  %v1022_v42 = vadd.f32 %v2285_v0, %v984_v18  ;;  %v1023_v51 = vadd.f32 %v2285_v0, %v985_v27 }
 0x28f   :  { %v1080_v15 = vpack.c.bf16 %v1050_v4, %v1049_v31  ;;  %v1079_v6 = vpack.c.bf16 %v1048_v16, %v1047_v39  ;;  %v1024_v46 = vadd.f32 %v2285_v0, %v986_v48  ;;  %v1043_v55 = vadd.f32 %v2285_v0, %v1005_v34 }
 0x290   :  { %v1081_v63 = vpack.c.bf16 %v1052_v32, %v1051_v17  ;;  %v1045_v37 = vadd.f32 %v2285_v0, %v1007_v29  ;;  %v1046_v40 = vadd.f32 %v2285_v0, %v1008_v9  ;;  %v1076_v43 = vmax.f32 %v1044_v35, 0.0 }
 0x291   :  { %1588 = vmatprep.mubr.bf16.mxu0 %v1079_v6  ;;  %v1053_v44 = vmax.f32 %v1021_v24, 0.0  ;;  %v1054_v45 = vmax.f32 %v1022_v42, 0.0  ;;  %v1055_v5 = vmax.f32 %v1023_v51, 0.0  ;;  %v1056_v52 = vmax.f32 %v1024_v46, 0.0 }
 0x292   :  { %1589 = vmatmul.mubr.bf16.vlgmr.msra.gmra.mxu0 %v1080_v15  ;;  %v987_v38 = vmul.f32 %v2154_v50, %v2282_v54  ;;  %v988_v41 = vmul.f32 %v2164_v61, %v2282_v54  ;;  %v1075_v60 = vmax.f32 %v1043_v55, 0.0  ;;  %v989_v14 = vmul.f32 %v2282_v54, %v2179_v57 }
 0x293   :  { %1592 = vmatprep.mubr.bf16.mxu0 %v1081_v63  ;;  %v990_v47 = vmul.f32 %v2282_v54, %v2189_v19  ;;  %v1077_v3 = vmax.f32 %v1045_v37, 0.0  ;;  %v1078_v62 = vmax.f32 %v1046_v40, 0.0  ;;  %v1082_v10 = vpack.c.bf16 %v1054_v45, %v1053_v44 }
 0x294   :  { %v1025_v8 = vadd.f32 %v2285_v0, %v987_v38  ;;  %v1026_v1 = vadd.f32 %v2285_v0, %v988_v41  ;;  %v2338_v13 = vpack.c.bf16 %v1076_v43, %v1075_v60  ;;  %v1027_v50 = vadd.f32 %v2285_v0, %v989_v14 }
 0x295   :  { %v1028_v61 = vadd.f32 %v2285_v0, %v990_v47  ;;  %v1083_v22 = vpack.c.bf16 %v1056_v52, %v1055_v5  ;;  %v2342_v12 = vpack.c.bf16 %v1078_v62, %v1077_v3  ;;  %v991_v31 = vmul.f32 %v2174_v11, %v2282_v54 }
 0x296   :  { %v1057_v57 = vmax.f32 %v1025_v8, 0.0  ;;  %v1058_v19 = vmax.f32 %v1026_v1, 0.0  ;;  %v1059_v28 = vmax.f32 %v1027_v50, 0.0  ;;  %v992_v4 = vmul.f32 %v2184_v25, %v2282_v54 }
 0x297   :  { %v1060_v26 = vmax.f32 %v1028_v61, 0.0  ;;  %v993_v39 = vmul.f32 %v2282_v54, %v2199_v7  ;;  %v994_v16 = vmul.f32 %v2282_v54, %v2209_v30  ;;  %v1029_v17 = vadd.f32 %v2285_v0, %v991_v31 }
 0x298   :  { %v1030_v23 = vadd.f32 %v2285_v0, %v992_v4  ;;  %v1084_v18 = vpack.c.bf16 %v1058_v19, %v1057_v57  ;;  %v995_v7 = vmul.f32 %v2194_v21, %v2282_v54  ;;  %v996_v30 = vmul.f32 %v2204_v36, %v2282_v54 }
 0x299   :  { %v1031_v27 = vadd.f32 %v2285_v0, %v993_v39  ;;  %v1032_v32 = vadd.f32 %v2285_v0, %v994_v16  ;;  %v1085_v35 = vpack.c.bf16 %v1060_v26, %v1059_v28  ;;  %v1061_v11 = vmax.f32 %v1029_v17, 0.0 }
 0x29a   :  { %1593 = vmatmul.mubr.bf16.gmra.mxu0 %v1082_v10  ;;  %v1062_v25 = vmax.f32 %v1030_v23, 0.0  ;;  %v997_v6 = vmul.f32 %v2282_v54, %v2219_v49  ;;  %v998_v34 = vmul.f32 %v2282_v54, %v2229_v58  ;;  %v1033_v29 = vadd.f32 %v2285_v0, %v995_v7 }
 0x29b   :  { %1596 = vmatprep.mubr.bf16.mxu0 %v1083_v22  ;;  %v1063_v48 = vmax.f32 %v1031_v27, 0.0  ;;  %v1064_v15 = vmax.f32 %v1032_v32, 0.0  ;;  %v1034_v24 = vadd.f32 %v2285_v0, %v996_v30  ;;  %v999_v49 = vmul.f32 %v2214_v33, %v2282_v54 }
 0x29c   :  { %v1086_v42 = vpack.c.bf16 %v1062_v25, %v1061_v11  ;;  %v1035_v9 = vadd.f32 %v2285_v0, %v997_v6  ;;  %v1036_v51 = vadd.f32 %v2285_v0, %v998_v34  ;;  %v1065_v21 = vmax.f32 %v1033_v29, 0.0 }
 0x29d   :  { %v1087_v46 = vpack.c.bf16 %v1064_v15, %v1063_v48  ;;  %v1066_v36 = vmax.f32 %v1034_v24, 0.0  ;;  %v1000_v58 = vmul.f32 %v2224_v56, %v2282_v54  ;;  %v1001_v37 = vmul.f32 %v2282_v54, %v2239_v59 }
 0x29e   :  { %v1067_v63 = vmax.f32 %v1035_v9, 0.0  ;;  %v1068_v55 = vmax.f32 %v1036_v51, 0.0  ;;  %v1002_v40 = vmul.f32 %v2282_v54, %v2249_v20  ;;  %v1037_v43 = vadd.f32 %v2285_v0, %v999_v49 }
 0x29f   :  { %v1038_v44 = vadd.f32 %v2285_v0, %v1000_v58  ;;  %v1088_v45 = vpack.c.bf16 %v1066_v36, %v1065_v21  ;;  %v1039_v5 = vadd.f32 %v2285_v0, %v1001_v37  ;;  %v1003_v59 = vmul.f32 %v2234_v2, %v2282_v54  ;;  %v2391_v2 = vld [vmem:[%s2529_s8] ss:$0 sm:$0xff] }
 0x2a0   :  { %v1040_v52 = vadd.f32 %v2285_v0, %v1002_v40  ;;  %v1089_v38 = vpack.c.bf16 %v1068_v55, %v1067_v63  ;;  %v1069_v33 = vmax.f32 %v1037_v43, 0.0  ;;  %v1004_v20 = vmul.f32 %v2244_v53, %v2282_v54 }
 0x2a1   :  { %v1070_v56 = vmax.f32 %v1038_v44, 0.0  ;;  %v1071_v41 = vmax.f32 %v1039_v5, 0.0  ;;  %v1041_v14 = vadd.f32 %v2285_v0, %v1003_v59 }
 0x2a2   :  { %1597 = vmatmul.mubr.bf16.gmra.mxu0 %v1084_v18  ;;  %v1072_v60 = vmax.f32 %v1040_v52, 0.0  ;;  %v1042_v47 = vadd.f32 %v2285_v0, %v1004_v20 }
 0x2a3   :  { %1600 = vmatprep.mubr.bf16.mxu0 %v1085_v35  ;;  %v1090_v3 = vpack.c.bf16 %v1070_v56, %v1069_v33  ;;  %v1073_v8 = vmax.f32 %v1041_v14, 0.0 }
 0x2a4   :  { %v1091_v62 = vpack.c.bf16 %v1072_v60, %v1071_v41  ;;  %v1074_v1 = vmax.f32 %v1042_v47, 0.0 }
 0x2a6   :  { %v1092_v10 = vpack.c.bf16 %v1074_v1, %v1073_v8 }
 0x2aa   :  { %1601 = vmatmul.mubr.bf16.gmra.mxu0 %v1086_v42 }
 0x2ab   :  { %1604 = vmatprep.mubr.bf16.mxu0 %v1087_v46 }
 0x2b2   :  { %1605 = vmatmul.mubr.bf16.gmra.mxu0 %v1088_v45 }
 0x2b3   :  { %1608 = vmatprep.mubr.bf16.mxu0 %v1089_v38 }
 0x2ba   :  { %1609 = vmatmul.mubr.bf16.gmra.mxu0 %v1090_v3 }
 0x2bb   :  { %1612 = vmatprep.mubr.bf16.mxu0 %v1091_v62 }
 0x2c2   :  { %1613 = vmatmul.mubr.bf16.gmra.mxu0 %v1092_v10 }
 0x2c3   :  { %1616 = vmatprep.mubr.bf16.mxu0 %v2338_v13 }
 0x2ca   :  { %1617 = vmatmul.mubr.bf16.gmra.mxu0 %v2342_v12 }
 0x352   :  { %v1590_v53 = vpop.f32.mrf.mxu0 }
 0x353   :  { %v1209_v54 = vadd.f32 %v1590_v53, %v2391_v2 }
 0x354   :  { %v1200_v0 = vpop.f32.mrf.mxu0 }
 0x355   :  { %1329 = vst [vmem:[%s2530_s9 + $0x10] sm:$0xff] %v1209_v54  ;;  %v1201_v50 = vadd.f32 %v2391_v2, %v1200_v0 }
 0x356   :  { %v1591_v61 = vpop.f32.mrf.mxu0 }
 0x357   :  { %1327 = vst [vmem:[%s2530_s9] sm:$0xff] %v1201_v50  ;;  %v1212_v13 = vadd.f32 %v1591_v61, %v2391_v2 }
 0x358   :  { %v1203_v22 = vpop.f32.mrf.mxu0 }
 0x359   :  { %1330 = vst [vmem:[%s2530_s9 + $0x18] sm:$0xff] %v1212_v13  ;;  %v1204_v12 = vadd.f32 %v2391_v2, %v1203_v22 }
 0x35a   :  { %v1594_v57 = vpop.f32.mrf.mxu0 }
 0x35b   :  { %1328 = vst [vmem:[%s2530_s9 + $0x8] sm:$0xff] %v1204_v12  ;;  %v1225_v19 = vadd.f32 %v1594_v57, %v2391_v2 }
 0x35c   :  { %v1216_v28 = vpop.f32.mrf.mxu0 }
 0x35d   :  { %1333 = vst [vmem:[%s2530_s9 + $0x30] sm:$0xff] %v1225_v19  ;;  %v1217_v26 = vadd.f32 %v2391_v2, %v1216_v28 }
 0x35e   :  { %v1595_v31 = vpop.f32.mrf.mxu0 }
 0x35f   :  { %1331 = vst [vmem:[%s2530_s9 + $0x20] sm:$0xff] %v1217_v26  ;;  %v1228_v4 = vadd.f32 %v1595_v31, %v2391_v2 }
 0x360   :  { %v1219_v39 = vpop.f32.mrf.mxu0 }
 0x361   :  { %1334 = vst [vmem:[%s2530_s9 + $0x38] sm:$0xff] %v1228_v4  ;;  %v1220_v16 = vadd.f32 %v2391_v2, %v1219_v39 }
 0x362   :  { %v1598_v17 = vpop.f32.mrf.mxu0 }
 0x363   :  { %1332 = vst [vmem:[%s2530_s9 + $0x28] sm:$0xff] %v1220_v16  ;;  %v1241_v23 = vadd.f32 %v1598_v17, %v2391_v2 }
 0x364   :  { %v1232_v18 = vpop.f32.mrf.mxu0 }
 0x365   :  { %1337 = vst [vmem:[%s2530_s9 + $0x50] sm:$0xff] %v1241_v23  ;;  %v1233_v27 = vadd.f32 %v2391_v2, %v1232_v18 }
 0x366   :  { %v1599_v32 = vpop.f32.mrf.mxu0 }
 0x367   :  { %1335 = vst [vmem:[%s2530_s9 + $0x40] sm:$0xff] %v1233_v27  ;;  %v1244_v35 = vadd.f32 %v1599_v32, %v2391_v2 }
 0x368   :  { %v1235_v11 = vpop.f32.mrf.mxu0 }
 0x369   :  { %1338 = vst [vmem:[%s2530_s9 + $0x58] sm:$0xff] %v1244_v35  ;;  %v1236_v25 = vadd.f32 %v2391_v2, %v1235_v11 }
 0x36a   :  { %v1602_v48 = vpop.f32.mrf.mxu0 }
 0x36b   :  { %1336 = vst [vmem:[%s2530_s9 + $0x48] sm:$0xff] %v1236_v25  ;;  %v1257_v15 = vadd.f32 %v1602_v48, %v2391_v2 }
 0x36c   :  { %v1248_v7 = vpop.f32.mrf.mxu0 }
 0x36d   :  { %1341 = vst [vmem:[%s2530_s9 + $0x70] sm:$0xff] %v1257_v15  ;;  %v1249_v30 = vadd.f32 %v2391_v2, %v1248_v7 }
 0x36e   :  { %v1603_v6 = vpop.f32.mrf.mxu0 }
 0x36f   :  { %1339 = vst [vmem:[%s2530_s9 + $0x60] sm:$0xff] %v1249_v30  ;;  %v1260_v34 = vadd.f32 %v1603_v6, %v2391_v2 }
 0x370   :  { %v1251_v29 = vpop.f32.mrf.mxu0 }
 0x371   :  { %1342 = vst [vmem:[%s2530_s9 + $0x78] sm:$0xff] %v1260_v34  ;;  %v1252_v24 = vadd.f32 %v2391_v2, %v1251_v29 }
 0x372   :  { %v1606_v42 = vpop.f32.mrf.mxu0 }
 0x373   :  { %1340 = vst [vmem:[%s2530_s9 + $0x68] sm:$0xff] %v1252_v24  ;;  %v1273_v9 = vadd.f32 %v1606_v42, %v2391_v2 }
 0x374   :  { %v1264_v51 = vpop.f32.mrf.mxu0 }
 0x375   :  { %1345 = vst [vmem:[%s2530_s9 + $0x90] sm:$0xff] %v1273_v9  ;;  %v1265_v46 = vadd.f32 %v2391_v2, %v1264_v51 }
 0x376   :  { %v1607_v21 = vpop.f32.mrf.mxu0 }
 0x377   :  { %1343 = vst [vmem:[%s2530_s9 + $0x80] sm:$0xff] %v1265_v46  ;;  %v1276_v36 = vadd.f32 %v1607_v21, %v2391_v2 }
 0x378   :  { %v1267_v63 = vpop.f32.mrf.mxu0 }
 0x379   :  { %1346 = vst [vmem:[%s2530_s9 + $0x98] sm:$0xff] %v1276_v36  ;;  %v1268_v55 = vadd.f32 %v2391_v2, %v1267_v63 }
 0x37a   :  { %v1610_v49 = vpop.f32.mrf.mxu0 }
 0x37b   :  { %1344 = vst [vmem:[%s2530_s9 + $0x88] sm:$0xff] %v1268_v55  ;;  %v1289_v58 = vadd.f32 %v1610_v49, %v2391_v2 }
 0x37c   :  { %v1280_v37 = vpop.f32.mrf.mxu0 }
 0x37d   :  { %1349 = vst [vmem:[%s2530_s9 + $0xb0] sm:$0xff] %v1289_v58  ;;  %v1281_v40 = vadd.f32 %v2391_v2, %v1280_v37 }
 0x37e   :  { %v1611_v43 = vpop.f32.mrf.mxu0 }
 0x37f   :  { %1347 = vst [vmem:[%s2530_s9 + $0xa0] sm:$0xff] %v1281_v40  ;;  %v1292_v44 = vadd.f32 %v1611_v43, %v2391_v2 }
 0x380   :  { %v1283_v45 = vpop.f32.mrf.mxu0 }
 0x381   :  { %1350 = vst [vmem:[%s2530_s9 + $0xb8] sm:$0xff] %v1292_v44  ;;  %v1284_v5 = vadd.f32 %v2391_v2, %v1283_v45 }
 0x382   :  { %v1614_v52 = vpop.f32.mrf.mxu0 }
 0x383   :  { %1348 = vst [vmem:[%s2530_s9 + $0xa8] sm:$0xff] %v1284_v5  ;;  %v1305_v38 = vadd.f32 %v1614_v52, %v2391_v2 }
 0x384   :  { %v1296_v33 = vpop.f32.mrf.mxu0 }
 0x385   :  { %1353 = vst [vmem:[%s2530_s9 + $0xd0] sm:$0xff] %v1305_v38  ;;  %v1297_v56 = vadd.f32 %v2391_v2, %v1296_v33 }
 0x386   :  { %v1615_v41 = vpop.f32.mrf.mxu0 }
 0x387   :  { %1351 = vst [vmem:[%s2530_s9 + $0xc0] sm:$0xff] %v1297_v56  ;;  %v1308_v60 = vadd.f32 %v1615_v41, %v2391_v2 }
 0x388   :  { %v1299_v59 = vpop.f32.mrf.mxu0 }
 0x389   :  { %1354 = vst [vmem:[%s2530_s9 + $0xd8] sm:$0xff] %v1308_v60  ;;  %v1300_v20 = vadd.f32 %v2391_v2, %v1299_v59 }
 0x38a   :  { %v1618_v14 = vpop.f32.mrf.mxu0 }
 0x38b   :  { %1352 = vst [vmem:[%s2530_s9 + $0xc8] sm:$0xff] %v1300_v20  ;;  %v1321_v47 = vadd.f32 %v1618_v14, %v2391_v2 }
 0x38c   :  { %v1312_v3 = vpop.f32.mrf.mxu0 }
 0x38d   :  { %1357 = vst [vmem:[%s2530_s9 + $0xf0] sm:$0xff] %v1321_v47  ;;  %v1313_v62 = vadd.f32 %v2391_v2, %v1312_v3 }
 0x38e   :  { %v1619_v8 = vpop.f32.mrf.mxu0 }
 0x38f   :  { %1355 = vst [vmem:[%s2530_s9 + $0xe0] sm:$0xff] %v1313_v62  ;;  %v1324_v1 = vadd.f32 %v1619_v8, %v2391_v2 }
 0x390   :  { %v1315_v10 = vpop.f32.mrf.mxu0 }
 0x391   :  { %1358 = vst [vmem:[%s2530_s9 + $0xf8] sm:$0xff] %v1324_v1  ;;  %v1316_v53 = vadd.f32 %v2391_v2, %v1315_v10 }
 0x393   :  { %1356 = vst [vmem:[%s2530_s9 + $0xe8] sm:$0xff] %v1316_v53 }

</bundles_post_ra>
